<compile_context>
chip_gen: v7x
topology: tpu7x:2x2x1
jax: 0.10.0
libtpu: 0.0.40
codegen_flags: <defaults>
</compile_context>

<pallas_src>
import math

import jax
import jax.numpy as jnp
from jax import lax
from jax.experimental import pallas as pl
from jax.experimental.pallas import tpu as pltpu


def _head_kernel(x_ref, wkqv_ref, o_ref):
    # x_ref:    (1, T, C)  bf16 block for the current batch element
    # wkqv_ref: (C, 3H)    bf16 fused [key | query | value] projection weights
    # o_ref:    (1, T, H)  f32 output block
    x = x_ref[0]                                          # (T, C) bf16
    C = x.shape[-1]

    # Single fused projection: one MXU matmul with N = 3H instead of three with N = H.
    kqv = jnp.dot(x, wkqv_ref[...],
                  preferred_element_type=jnp.float32)     # (T, 3H) f32
    H = kqv.shape[-1] // 3
    k = kqv[:, :H]
    q = kqv[:, H:2 * H]
    v = kqv[:, 2 * H:]

    # Fold the C**-0.5 scale (matches `* C ** (-0.5)` in the PyTorch forward) into q:
    # O(T*H) instead of O(T^2) on the score matrix.
    q = q * jnp.float32(C ** (-0.5))

    # Attention scores: contract the H axis of both operands directly (no k.T).
    s = lax.dot_general(
        q.astype(jnp.bfloat16), k.astype(jnp.bfloat16),
        dimension_numbers=(((1,), (1,)), ((), ())),
        preferred_element_type=jnp.float32)               # (T, T) f32

    # Causal mask (== tril(ones(T,T)) == 0 -> masked); finite negative instead of -inf.
    T = s.shape[0]
    row = lax.broadcasted_iota(jnp.int32, (T, T), 0)
    col = lax.broadcasted_iota(jnp.int32, (T, T), 1)
    s = jnp.where(col <= row, s, jnp.float32(-1e30))

    # Numerically stable softmax in f32; normalization via EUP approximate reciprocal.
    m = jnp.max(s, axis=-1, keepdims=True)
    e = jnp.exp(s - m)
    den = jnp.sum(e, axis=-1, keepdims=True)
    p = e * pl.reciprocal(den, approx=True)

    # TODO(synk): nn.Dropout(p=0.2) is identity in eval/inference mode; training-mode
    # stochastic dropout (pltpu.prng_seed / prng_random_bits masking) is not applied.

    out = jnp.dot(p.astype(jnp.bfloat16), v.astype(jnp.bfloat16),
                  preferred_element_type=jnp.float32)     # (T, H) f32
    o_ref[0] = out.astype(o_ref.dtype)


def head_forward(x, wk, wq, wv):
    """x: (B, T, C) f32; wk/wq/wv: (C, H) f32 (pre-transposed Linear weights) -> (B, T, H) f32."""
    B, T, C = x.shape
    H = wk.shape[1]

    # Fuse the three projection weights into one (C, 3H) matrix and use bf16 MXU operands.
    # (In a real model the fused bf16 weight would be materialized once, not per call.)
    wkqv = jnp.concatenate([wk, wq, wv], axis=1).astype(jnp.bfloat16)
    x_bf16 = x.astype(jnp.bfloat16)

    return pl.pallas_call(
        _head_kernel,
        out_shape=jax.ShapeDtypeStruct((B, T, H), jnp.float32),
        grid_spec=pltpu.PrefetchScalarGridSpec(
            num_scalar_prefetch=0,
            grid=(B,),
            in_specs=[
                pl.BlockSpec((1, T, C), lambda b: (b, 0, 0)),
                pl.BlockSpec((C, 3 * H), lambda b: (0, 0)),
            ],
            out_specs=pl.BlockSpec((1, T, H), lambda b: (b, 0, 0)),
        ),
        compiler_params=pltpu.CompilerParams(
            # Batch axis is independent -> shards across the 2 TensorCores on v7x;
            # no-op on single-TC v5e/v6e.
            dimension_semantics=("parallel",),
        ),
    )(x_bf16, wkqv)


def reference_forward(x, wk, wq, wv):
    """Pure-JAX f32 reference with the PyTorch module's semantics."""
    B, T, C = x.shape
    k = x @ wk
    q = x @ wq
    v = x @ wv
    wei = (q @ jnp.swapaxes(k, -2, -1)) * C ** (-0.5)
    tril = jnp.tril(jnp.ones((T, T)))
    wei = jnp.where(tril == 0, -jnp.inf, wei)
    wei = jax.nn.softmax(wei, axis=-1)
    return wei @ v


if __name__ == "__main__":
    # Shapes implied by the module: C = n_embd = 400, T <= block_size = 100, head_size = 32.
    B, T, C, H = 2, 64, 400, 32

    key = jax.random.PRNGKey(0)
    kx, kk, kq, kv = jax.random.split(key, 4)

    x = jax.random.normal(kx, (B, T, C), dtype=jnp.float32)

    # PyTorch Linear-style uniform(-1/sqrt(C), 1/sqrt(C)) init, stored pre-transposed
    # as (C, H) so the kernel computes x @ W (== x @ weight.T in PyTorch).
    bound = 1.0 / math.sqrt(C)
    wk = jax.random.uniform(kk, (C, H), jnp.float32, -bound, bound)
    wq = jax.random.uniform(kq, (C, H), jnp.float32, -bound, bound)
    wv = jax.random.uniform(kv, (C, H), jnp.float32, -bound, bound)

    out = head_forward(x, wk, wq, wv)
    out = jax.block_until_ready(out)

    ref = reference_forward(x, wk, wq, wv)
    assert out.shape == (B, T, H)
    # bf16 MXU inputs (f32 accumulation) + approx reciprocal -> relaxed tolerance vs f32 ref.
    assert jnp.allclose(out, ref, atol=5e-2, rtol=5e-2), "mismatch vs reference"

    print("KERNEL_OK")
</pallas_src>

<mosaic_0001>
module attributes {stable_mosaic.version = 11 : i64} {
  func.func @_head_kernel(%arg0: i32, %arg1: memref<1x64x400xbf16, #tpu.memory_space<vmem>>, %arg2: memref<400x96xbf16, #tpu.memory_space<vmem>>, %arg3: memref<1x64x32xf32, #tpu.memory_space<vmem>>) attributes {dimension_semantics = [#tpu.dimension_semantics<parallel>], iteration_bounds = array<i64: 2>, scalar_prefetch = 0 : i64, scratch_operands = 0 : i64, tpu.core_type = #tpu.core_type<tc>, window_params = [{transform_indices = @transform_0, window_bounds = array<i64: 1, 64, 400>}, {pipeline_mode = #tpu.pipeline_mode<synchronous>, transform_indices = @transform_1, window_bounds = array<i64: 400, 96>}, {transform_indices = @transform_2, window_bounds = array<i64: 1, 64, 32>}]} {
    %c0 = arith.constant 0 : index
    %c0_0 = arith.constant 0 : index
    %c0_1 = arith.constant 0 : index
    %0 = vector.load %arg1[%c0, %c0_0, %c0_1] : memref<1x64x400xbf16, #tpu.memory_space<vmem>>, vector<1x64x400xbf16>
    %1 = vector.shape_cast %0 : vector<1x64x400xbf16> to vector<64x400xbf16>
    %c0_2 = arith.constant 0 : index
    %c0_3 = arith.constant 0 : index
    %2 = vector.load %arg2[%c0_2, %c0_3] : memref<400x96xbf16, #tpu.memory_space<vmem>>, vector<400x96xbf16>
    %cst = arith.constant dense<0.000000e+00> : vector<64x96xf32>
    %3 = tpu.matmul %1, %2, %cst {dimension_numbers = #tpu.dot_dimension_numbers<[1], [0], [0], [1], [0, 0, 1, 1], [], []>} : vector<64x400xbf16>, vector<400x96xbf16>, vector<64x96xf32> -> vector<64x96xf32>
    %4 = vector.extract_strided_slice %3 {offsets = [0, 0], sizes = [64, 32], strides = [1, 1]} : vector<64x96xf32> to vector<64x32xf32>
    %5 = vector.extract_strided_slice %3 {offsets = [0, 32], sizes = [64, 32], strides = [1, 1]} : vector<64x96xf32> to vector<64x32xf32>
    %6 = vector.extract_strided_slice %3 {offsets = [0, 64], sizes = [64, 32], strides = [1, 1]} : vector<64x96xf32> to vector<64x32xf32>
    %cst_4 = arith.constant 5.000000e-02 : f32
    %7 = vector.broadcast %cst_4 : f32 to vector<64x32xf32>
    %8 = arith.mulf %5, %7 : vector<64x32xf32>
    %9 = arith.truncf %8 : vector<64x32xf32> to vector<64x32xbf16>
    %10 = arith.truncf %4 : vector<64x32xf32> to vector<64x32xbf16>
    %cst_5 = arith.constant dense<0.000000e+00> : vector<64x64xf32>
    %11 = tpu.matmul %9, %10, %cst_5 {dimension_numbers = #tpu.dot_dimension_numbers<[1], [1], [0], [0], [0, 0, 1, 0], [], []>} : vector<64x32xbf16>, vector<64x32xbf16>, vector<64x64xf32> -> vector<64x64xf32>
    %12 = tpu.iota {dimensions = array<i32: 0>} : vector<64x64xi32>
    %13 = tpu.iota {dimensions = array<i32: 1>} : vector<64x64xi32>
    %14 = arith.cmpi sle, %13, %12 : vector<64x64xi32>
    %cst_6 = arith.constant -1.000000e+30 : f32
    %15 = vector.broadcast %cst_6 : f32 to vector<64x64xf32>
    %16 = arith.select %14, %11, %15 : vector<64x64xi1>, vector<64x64xf32>
    %cst_7 = arith.constant dense<0xFF800000> : vector<64xf32>
    %17 = vector.multi_reduction <maximumf>, %16, %cst_7 [1] : vector<64x64xf32> to vector<64xf32>
    %18 = vector.shape_cast %17 : vector<64xf32> to vector<64x1xf32>
    %19 = vector.broadcast %18 : vector<64x1xf32> to vector<64x64xf32>
    %20 = arith.subf %16, %19 : vector<64x64xf32>
    %21 = math.exp %20 : vector<64x64xf32>
    %cst_8 = arith.constant dense<0.000000e+00> : vector<64xf32>
    %22 = vector.multi_reduction <add>, %21, %cst_8 [1] : vector<64x64xf32> to vector<64xf32>
    %23 = vector.shape_cast %22 : vector<64xf32> to vector<64x1xf32>
    %24 = tpu.reciprocal %23 {approx = true} : vector<64x1xf32> -> vector<64x1xf32>
    %25 = vector.broadcast %24 : vector<64x1xf32> to vector<64x64xf32>
    %26 = arith.mulf %21, %25 : vector<64x64xf32>
    %27 = arith.truncf %26 : vector<64x64xf32> to vector<64x64xbf16>
    %28 = arith.truncf %6 : vector<64x32xf32> to vector<64x32xbf16>
    %cst_9 = arith.constant dense<0.000000e+00> : vector<64x32xf32>
    %29 = tpu.matmul %27, %28, %cst_9 {dimension_numbers = #tpu.dot_dimension_numbers<[1], [0], [0], [1], [0, 0, 1, 1], [], []>} : vector<64x64xbf16>, vector<64x32xbf16>, vector<64x32xf32> -> vector<64x32xf32>
    %c0_10 = arith.constant 0 : index
    %c0_11 = arith.constant 0 : index
    %c0_12 = arith.constant 0 : index
    %30 = vector.load %arg3[%c0_10, %c0_11, %c0_12] : memref<1x64x32xf32, #tpu.memory_space<vmem>>, vector<1x64x32xf32>
    %31 = vector.shape_cast %30 : vector<1x64x32xf32> to vector<64x32xf32>
    %32 = vector.shape_cast %29 : vector<64x32xf32> to vector<1x64x32xf32>
    tpu.vector_store %arg3[%c0_10, %c0_11, %c0_12], %32 {strides = array<i32>} : memref<1x64x32xf32, #tpu.memory_space<vmem>>, vector<1x64x32xf32>,
    return
  }
  func.func @transform_0(%arg0: i32) -> (i32, i32, i32) {
    %c0_i32 = arith.constant 0 : i32
    %c0_i32_0 = arith.constant 0 : i32
    %c0_i32_1 = arith.constant 0 : i32
    return %arg0, %c0_i32, %c0_i32_0 : i32, i32, i32
  }
  func.func @transform_1(%arg0: i32) -> (i32, i32) {
    %c0_i32 = arith.constant 0 : i32
    %c0_i32_0 = arith.constant 0 : i32
    %c0_i32_1 = arith.constant 0 : i32
    return %c0_i32, %c0_i32_0 : i32, i32
  }
  func.func @transform_2(%arg0: i32) -> (i32, i32, i32) {
    %c0_i32 = arith.constant 0 : i32
    %c0_i32_0 = arith.constant 0 : i32
    %c0_i32_1 = arith.constant 0 : i32
    return %arg0, %c0_i32, %c0_i32_0 : i32, i32, i32
  }
}

</mosaic_0001>

<bundles_post_ra>
// kernel: tpu_custom_call.1
= control target key start
LH: loop header
LB: loop body
LE: loop exit
PB: predicated region body
PF: predicated region fallthrough
CT: control target
= control target key end

     0   :  { %s1250_s9 = smov 0   ;;  %s1457_s0 = inlined_call_operand.vmem [shape: bf16[2,64,400], index: 0, kind: input, shape index: {}]   ;;  %s1458_s1 = inlined_call_operand.vmem [shape: bf16[400,96], index: 1, kind: input, shape index: {}]   ;;  %s1459_s2 = inlined_call_operand.vmem [shape: f32[2,64,32], index: 2, kind: output, shape index: {}]  }
   0x1 LB: > { %s974_s10 = sadd.s32 4294967295, %s1230_s9   ;;  %p978_p0 = scmp.ge.s32.totalorder %s1230_s9, 1  ;;  %s1230_s9 = sphi %s1250_s9, %s12_s9  }
   0x2   : > { %p112_p1 = scmp.lt.s32.totalorder %s1230_s9, 3 }
   0x4   : > { %p113_p2 = pnand %p978_p0, %p112_p1 }
   0x5   : > { %v1143_v0 = vld [vmem:[%s1458_s1 + $0x40] sm:$0xff] (!%p113_p2)   ;;  %v1232_v1 = vmov (!%p113_p2), 0   ;;  %v1146_v4 = vld [vmem:[%s1458_s1 + $0x48] sm:$0xff] (!%p113_p2)   ;;  %v1149_v7 = vld [vmem:[%s1458_s1 + $0x50] sm:$0xff] (!%p113_p2)   ;;  %p134_p3 = scmp.lt.s32.totalorder (!%p113_p2), %s974_s10, 1  ;;  %vm437_vm0 = vcmask (!%p113_p2), 130048  }
   0x6   : > { %116 = sbr.rel (%p113_p2) target bundleno = 1166 (0x48e), region = 28  ;;  %515 = vmatprep.subr.bf16.mxu1 (!%p113_p2), %v1232_v1  ;;  %v1144_v2 = vld [vmem:[%s1458_s1 + $0x80] sm:$0xff] (!%p113_p2)   ;;  %1040 = vmatprep.subr.bf16.mxu0 (!%p113_p2), %v1143_v0  ;;  %v1147_v5 = vld [vmem:[%s1458_s1 + $0x88] sm:$0xff] (!%p113_p2)   ;;  %v1150_v8 = vld [vmem:[%s1458_s1 + $0x90] sm:$0xff] (!%p113_p2)   ;;  %vm608_vm1 = vcmask (!%p113_p2), 261120   ;;  %s1233_s13 = smov (!%p113_p2), 96  }
   0x7   : > { %v1145_v3 = vld [vmem:[%s1458_s1] sm:$0xff] (!%p113_p2)   ;;  %516 = vmatpush1.bf16.msra.mxu1 (!%p113_p2), %v1144_v2  ;;  %v1148_v6 = vld [vmem:[%s1458_s1 + $0x8] sm:$0xff] (!%p113_p2)   ;;  %v1151_v9 = vld [vmem:[%s1458_s1 + $0x10] sm:$0xff] (!%p113_p2)   ;;  %vm725_vm3 = vcmask (!%p113_p2), 523264   ;;  %s1234_s14 = smov (!%p113_p2), 64  }
   0x8   : > { %1041 = vmatpush3.bf16.msra.mxu0 (!%p113_p2), %v1145_v3  ;;  %517 = vmatprep.subr.bf16.mxu1 (!%p113_p2), %v1232_v1  ;;  %v1152_v10 = vld [vmem:[%s1458_s1 + $0x58] sm:$0xff] (!%p113_p2)   ;;  %v1155_v13 = vld [vmem:[%s1458_s1 + $0x60] sm:$0xff] (!%p113_p2)   ;;  %v1158_v16 = vld [vmem:[%s1458_s1 + $0x68] sm:$0xff] (!%p113_p2)  }
   0x9   : > { %1042 = vmatprep.subr.bf16.mxu0 (!%p113_p2), %v1146_v4  ;;  %v1153_v11 = vld [vmem:[%s1458_s1 + $0x98] sm:$0xff] (!%p113_p2)   ;;  %v1156_v14 = vld [vmem:[%s1458_s1 + $0xa0] sm:$0xff] (!%p113_p2)   ;;  %v1159_v17 = vld [vmem:[%s1458_s1 + $0xa8] sm:$0xff] (!%p113_p2)  }
   0xa   : > { %v1154_v12 = vld [vmem:[%s1458_s1 + $0x18] sm:$0xff] (!%p113_p2)   ;;  %v1157_v15 = vld [vmem:[%s1458_s1 + $0x20] sm:$0xff] (!%p113_p2)   ;;  %v1160_v18 = vld [vmem:[%s1458_s1 + $0x28] sm:$0xff] (!%p113_p2)  }
   0xb   : > { %518 = vmatpush1.bf16.msra.mxu1 (!%p113_p2), %v1147_v5  ;;  %v1161_v19 = vld [vmem:[%s1458_s1 + $0x70] sm:$0xff] (!%p113_p2)   ;;  %v1164_v22 = vld [vmem:[%s1458_s1 + $0x78] sm:$0xff] (!%p113_p2)   ;;  %v1170_v28 = vld [vmem:[%s1458_s1 + $0xc0] sm:$0xff] (!%p113_p2)  }
   0xc   : > { %1043 = vmatpush3.bf16.msra.mxu0 (!%p113_p2), %v1148_v6  ;;  %519 = vmatprep.subr.bf16.mxu1 (!%p113_p2), %v1232_v1  ;;  %v1162_v20 = vld [vmem:[%s1458_s1 + $0xb0] sm:$0xff] (!%p113_p2)   ;;  %v1165_v24 = vld [vmem:[%s1458_s1 + $0xb8] sm:$0xff] (!%p113_p2)  }
   0xd   : > { %1044 = vmatprep.subr.bf16.mxu0 %v1149_v7  ;;  %s1461_s10 = smov (!%p134_p3, %s974_s10), 1  ;;  %v1163_v21 = vld [vmem:[%s1458_s1 + $0x30] sm:$0xff]   ;;  %v1166_v26 = vld [vmem:[%s1458_s1 + $0x38] sm:$0xff]  }
   0xe   : > { %s1038_s19 = sshll.u32 %s1461_s10, 7  ;;  %s1039_s15 = sshll.u32 %s1461_s10, 6 }
   0xf   : > { %520 = vmatpush1.bf16.msra.mxu1 %v1150_v8  ;;  %s1334_s28 = scalar_lea.vmem %s1457_s0, %s1038_s19  ;;  %s143_s18 = scalar_lea.vmem %s1459_s2, %s1039_s15 }
  0x10   : > { %1045 = vmatpush3.bf16.msra.mxu0 %v1151_v9  ;;  %521 = vmatprep.subr.bf16.mxu1 %v1232_v1  ;;  %v1169_v23 = vld [vmem:[%s1334_s28 + $0x4] ss:$16 sps:$4 sm:$0xff]   ;;  %v1173_v25 = vld [vmem:[%s1334_s28 + $0xc] ss:$16 sps:$4 sm:$0xff]   ;;  %v1167_v27 = vld [vmem:[%s1334_s28] ss:$16 sps:$4 sm:$0xff]  }
  0x11   : > { %1046 = vmatprep.subr.bf16.mxu0 %v1152_v10  ;;  %482 = vmatprep.mubr.bf16.mxu0 %v1169_v23  ;;  %v1174_v29 = vld [vmem:[%s1334_s28 + $0x24] ss:$16 sps:$4 sm:$0xff]   ;;  %v1171_v30 = vld [vmem:[%s1334_s28 + $0x8] ss:$16 sps:$4 sm:$0xff]   ;;  %v1177_v31 = vld [vmem:[%s1334_s28 + $0x2c] ss:$16 sps:$4 sm:$0xff]  }
  0x12   : > { %1024 = vmatprep.mubr.msk.bf16.mxu1 %vm437_vm0, %v1173_v25  ;;  %v1176_v32 = vld [vmem:[%s1334_s28 + $0x20] ss:$16 sps:$4 sm:$0xff]   ;;  %v1180_v33 = vld [vmem:[%s1334_s28 + $0x44] ss:$16 sps:$4 sm:$0xff]   ;;  %v1179_v34 = vld [vmem:[%s1334_s28 + $0x28] ss:$16 sps:$4 sm:$0xff]  }
  0x13   : > { %522 = vmatpush1.bf16.msra.mxu1 %v1153_v11  ;;  %v1183_v35 = vld [vmem:[%s1334_s28 + $0x4c] ss:$16 sps:$4 sm:$0xff]   ;;  %v1182_v36 = vld [vmem:[%s1334_s28 + $0x40] ss:$16 sps:$4 sm:$0xff]   ;;  %v1186_v37 = vld [vmem:[%s1334_s28 + $0x64] ss:$16 sps:$4 sm:$0xff]  }
  0x14   : > { %1047 = vmatpush3.bf16.msra.mxu0 %v1154_v12  ;;  %523 = vmatprep.subr.bf16.mxu1 %v1232_v1  ;;  %v1185_v38 = vld [vmem:[%s1334_s28 + $0x48] ss:$16 sps:$4 sm:$0xff]   ;;  %v1189_v39 = vld [vmem:[%s1334_s28 + $0x6c] ss:$16 sps:$4 sm:$0xff]   ;;  %v1188_v40 = vld [vmem:[%s1334_s28 + $0x60] ss:$16 sps:$4 sm:$0xff]  }
  0x15   : > { %1048 = vmatprep.subr.bf16.mxu0 %v1155_v13  ;;  %v1191_v41 = vld [vmem:[%s1334_s28 + $0x68] ss:$16 sps:$4 sm:$0xff]  }
  0x17   : > { %524 = vmatpush1.bf16.msra.mxu1 %v1156_v14 }
  0x18   : > { %1049 = vmatpush3.bf16.msra.mxu0 %v1157_v15  ;;  %525 = vmatprep.subr.bf16.mxu1 %v1232_v1 }
  0x19   : > { %1050 = vmatprep.subr.bf16.mxu0 %v1158_v16 }
  0x1b   : > { %526 = vmatpush1.bf16.msra.mxu1 %v1159_v17 }
  0x1c   : > { %1051 = vmatpush3.bf16.msra.mxu0 %v1160_v18  ;;  %527 = vmatprep.subr.bf16.mxu1 %v1232_v1 }
  0x1d   : > { %1052 = vmatprep.subr.bf16.mxu0 %v1161_v19 }
  0x1f   : > { %528 = vmatpush1.bf16.msra.mxu1 %v1162_v20 }
  0x20   : > { %1053 = vmatpush3.bf16.msra.mxu0 %v1163_v21  ;;  %529 = vmatprep.subr.bf16.mxu1 %v1232_v1 }
  0x21   : > { %1054 = vmatprep.subr.bf16.mxu0 %v1164_v22 }
  0x23   : > { %530 = vmatpush1.bf16.msra.mxu1 %v1165_v24 }
  0x24   : > { %1055 = vmatpush3.bf16.msra.mxu0 %v1166_v26  ;;  %531 = vmatprep.subr.bf16.mxu1 %v1232_v1 }
  0x27   : > { %483 = vmatmul.mubr.bf16.vlgmr.msra.gmra.mrb[0].mxu0 %v1167_v27  ;;  %532 = vmatpush1.bf16.msra.mxu1 %v1170_v28 }
  0x28   : > { %490 = vmatprep.mubr.bf16.mxu0 %v1174_v29 }
  0x2a   : > { %548 = vmatmul.mubr.bf16.vlgmr.msra.gmra.mrb[0].mxu1 %v1171_v30 }
  0x2b   : > { %1025 = vmatprep.mubr.msk.bf16.mxu1 %vm437_vm0, %v1177_v31 }
  0x2f   : > { %491 = vmatmul.mubr.bf16.gmra.mrb[4].mxu0 %v1176_v32 }
  0x30   : > { %498 = vmatprep.mubr.bf16.mxu0 %v1180_v33 }
  0x32   : > { %556 = vmatmul.mubr.bf16.gmra.mrb[4].mxu1 %v1179_v34 }
  0x33   : > { %1026 = vmatprep.mubr.msk.bf16.mxu1 %vm437_vm0, %v1183_v35 }
  0x37   : > { %499 = vmatmul.mubr.bf16.gmra.mrb[8].mxu0 %v1182_v36 }
  0x38   : > { %506 = vmatprep.mubr.bf16.mxu0 %v1186_v37 }
  0x3a   : > { %564 = vmatmul.mubr.bf16.gmra.mrb[8].mxu1 %v1185_v38 }
  0x3b   : > { %1027 = vmatprep.mubr.msk.bf16.mxu1 %vm437_vm0, %v1189_v39 }
  0x3f   : > { %507 = vmatmul.mubr.bf16.gmra.mrb[12].mxu0 %v1188_v40 }
  0x42   : > { %572 = vmatmul.mubr.bf16.gmra.mrb[12].mxu1 %v1191_v41 }
  0xfa   : > { %v1056_v42 = vpop.f32.mrb[0].mxu0 }
  0xfb   : > { %v1057_v43 = vpop.f32.mrb[1].mxu0 }
  0xfc   : > { %v1058_v44 = vadd.f32 %v1057_v43, %v1056_v42  ;;  %v1059_v45 = vpop.f32.mrb[2].mxu0 }
  0xfd   : > { %v1060_v46 = vpop.f32.mrb[3].mxu0  ;;  %v549_v47 = vpop.f32.mrb[0].mxu1 }
  0xfe   : > { %v1061_v48 = vadd.f32 %v1060_v46, %v1059_v45  ;;  %v550_v49 = vadd.f32 %v1058_v44, %v549_v47  ;;  %v551_v50 = vpop.f32.mrb[1].mxu1 }
  0xff   : > { %v552_v51 = vpop.f32.mrb[2].mxu1  ;;  %v698_v50 = vlaneseq }
 0x100   : > { %v553_v52 = vadd.f32 %v1061_v48, %v552_v51  ;;  %v554_v53 = vpop.f32.mrb[3].mxu1  ;;  %v580_v54 = vmul.f32 0.05, %v550_v49 }
 0x101   : > { %v699_v51 = vshrl.u32 %v698_v50, 7 }
 0x102   : > { %v581_v55 = vmul.f32 0.05, %v553_v52  ;;  %v1374_v56 = vpack.c.bf16 %v553_v52, %v550_v49  ;;  %v1062_v57 = vpop.f32.mrb[4].mxu0  ;;  %v708_v52 = vand.u32 127, %v698_v50 }
 0x103   : > { %v1063_v58 = vpop.f32.mrb[5].mxu0  ;;  %v701_v53 = vadd.s32 16, %v699_v51 }
 0x104   : > { %v1064_v59 = vadd.f32 %v1063_v58, %v1062_v57  ;;  %v1065_v60 = vpop.f32.mrb[6].mxu0  ;;  %1128 = vmatprep.subr.msk.bf16.mxu0 %vm608_vm1, %v1374_v56  ;;  %v622_v61 = vsel %vm608_vm1, %v1374_v56, 0  ;;  %v588_v62 = vpack.c.bf16 %v581_v55, %v580_v54  ;;  %v700_v54 = vadd.s32 8, %v699_v51 }
 0x105   : > { %v1066_v63 = vpop.f32.mrb[7].mxu0  ;;  %v557_v0 = vpop.f32.mrb[4].mxu1  ;;  %1097 = vmatpush3.bf16.xpose.msra.mxu0 %v622_v61  ;;  %vm709_vm2 = vcmp.le.s32.totalorder %v708_v52, %v699_v51  ;;  %vm711_vm4 = vcmp.le.s32.totalorder %v708_v52, %v701_v53  ;;  %v702_v58 = vadd.s32 24, %v699_v51 }
 0x106   : > { %v1067_v1 = vadd.f32 %v1066_v63, %v1065_v60  ;;  %v558_v2 = vadd.f32 %v1064_v59, %v557_v0  ;;  %v559_v3 = vpop.f32.mrb[5].mxu1  ;;  %600 = vrot.lane.b32.xlu0 %v588_v62, %s1233_s13  ;;  %vm710_vm5 = vcmp.le.s32.totalorder %v708_v52, %v700_v54 }
 0x107   : > { %v560_v4 = vpop.f32.mrb[6].mxu1  ;;  %vm712_vm6 = vcmp.le.s32.totalorder %v708_v52, %v702_v58 }
 0x108   : > { %v561_v5 = vadd.f32 %v1067_v1, %v560_v4  ;;  %v562_v6 = vpop.f32.mrb[7].mxu1  ;;  %v582_v7 = vmul.f32 0.05, %v558_v2 }
 0x109   : > { %v705_v6 = vadd.s32 48, %v699_v51 }
 0x10a   : > { %v583_v8 = vmul.f32 0.05, %v561_v5  ;;  %v1381_v9 = vpack.c.bf16 %v561_v5, %v558_v2  ;;  %v1068_v10 = vpop.f32.mrb[8].mxu0  ;;  %v703_v5 = vadd.s32 32, %v699_v51 }
 0x10b   : > { %v1069_v11 = vpop.f32.mrb[9].mxu0  ;;  %vm715_vm8 = vcmp.le.s32.totalorder %v708_v52, %v705_v6 }
 0x10c   : > { %v1070_v12 = vadd.f32 %v1069_v11, %v1068_v10  ;;  %v1071_v13 = vpop.f32.mrb[10].mxu0  ;;  %1129 = vmatprep.subr.msk.bf16.mxu0 %vm608_vm1, %v1381_v9  ;;  %v625_v14 = vsel %vm608_vm1, %v1381_v9, 0  ;;  %v589_v15 = vpack.c.bf16 %v583_v8, %v582_v7  ;;  %v704_v7 = vadd.s32 40, %v699_v51 }
 0x10d   : > { %v1072_v16 = vpop.f32.mrb[11].mxu0  ;;  %v565_v17 = vpop.f32.mrb[8].mxu1  ;;  %1099 = vmatpush3.bf16.xpose.msra.mxu0 %v625_v14  ;;  %vm713_vm7 = vcmp.le.s32.totalorder %v708_v52, %v703_v5  ;;  %v706_v8 = vadd.s32 56, %v699_v51 }
 0x10e   : > { %v1073_v18 = vadd.f32 %v1072_v16, %v1071_v13  ;;  %v566_v19 = vadd.f32 %v1070_v12, %v565_v17  ;;  %v567_v20 = vpop.f32.mrb[9].mxu1  ;;  %602 = vrot.lane.b32.xlu0 %v589_v15, %s1233_s13  ;;  %vm714_vm9 = vcmp.le.s32.totalorder %v708_v52, %v704_v7 }
 0x10f   : > { %v568_v21 = vpop.f32.mrb[10].mxu1  ;;  %vm716_vm10 = vcmp.le.s32.totalorder %v708_v52, %v706_v8 }
 0x110   : > { %v569_v22 = vadd.f32 %v1073_v18, %v568_v21  ;;  %v570_v23 = vpop.f32.mrb[11].mxu1  ;;  %v584_v24 = vmul.f32 0.05, %v566_v19 }
 0x112   : > { %v585_v25 = vmul.f32 0.05, %v569_v22  ;;  %v1388_v26 = vpack.c.bf16 %v569_v22, %v566_v19  ;;  %v1074_v27 = vpop.f32.mrb[12].mxu0 }
 0x113   : > { %v1075_v28 = vpop.f32.mrb[13].mxu0 }
 0x114   : > { %v1076_v29 = vadd.f32 %v1075_v28, %v1074_v27  ;;  %v1077_v30 = vpop.f32.mrb[14].mxu0  ;;  %1130 = vmatprep.subr.msk.bf16.mxu0 %vm608_vm1, %v1388_v26  ;;  %v628_v31 = vsel %vm608_vm1, %v1388_v26, 0  ;;  %v590_v32 = vpack.c.bf16 %v585_v25, %v584_v24 }
 0x115   : > { %v1078_v33 = vpop.f32.mrb[15].mxu0  ;;  %v573_v34 = vpop.f32.mrb[12].mxu1  ;;  %1101 = vmatpush3.bf16.xpose.msra.mxu0 %v628_v31 }
 0x116   : > { %v1079_v35 = vadd.f32 %v1078_v33, %v1077_v30  ;;  %v574_v36 = vadd.f32 %v1076_v29, %v573_v34  ;;  %v575_v37 = vpop.f32.mrb[13].mxu1  ;;  %604 = vrot.lane.b32.xlu1 %v590_v32, %s1233_s13 }
 0x117   : > { %v576_v38 = vpop.f32.mrb[14].mxu1 }
 0x118   : > { %v577_v39 = vadd.f32 %v1079_v35, %v576_v38  ;;  %v578_v40 = vpop.f32.mrb[15].mxu1  ;;  %v586_v41 = vmul.f32 0.05, %v574_v36 }
 0x11a   : > { %v587_v42 = vmul.f32 0.05, %v577_v39  ;;  %v1395_v43 = vpack.c.bf16 %v577_v39, %v574_v36 }
 0x11c   : > { %1131 = vmatprep.subr.msk.bf16.mxu0 %vm608_vm1, %v1395_v43  ;;  %v631_v44 = vsel %vm608_vm1, %v1395_v43, 0  ;;  %v591_v45 = vpack.c.bf16 %v587_v42, %v586_v41 }
 0x11d   : > { %1103 = vmatpush3.bf16.xpose.msra.mxu0 %v631_v44 }
 0x11e   : > { %606 = vrot.lane.b32.xlu1 %v591_v45, %s1233_s13 }
 0x178   : > { %v601_v46 = vpop.permute.xlu0 %600 }
 0x179   : > { %1104 = vmatprep.mubr.msk.bf16.mxu0 %vm608_vm1, %v601_v46 }
 0x180   : > { %v603_v47 = vpop.permute.xlu0 %602 }
 0x181   : > { %1105 = vmatmul.mubr.msk.bf16.vlgmr.msra.gmra.mrb[16].mxu0 %vm608_vm1, %v603_v47 }
 0x188   : > { %v605_v48 = vpop.permute.xlu1 %604 }
 0x189   : > { %1108 = vmatprep.mubr.msk.bf16.mxu0 %vm608_vm1, %v605_v48 }
 0x190   : > { %v607_v49 = vpop.permute.xlu1 %606 }
 0x191   : > { %1109 = vmatmul.mubr.msk.bf16.gmra.mrb[20].mxu0 %vm608_vm1, %v607_v49 }
 0x254   : > { %v1106_v55 = vpop.f32.mrb[16].mxu0 }
 0x255   : > { %v667_v57 = vpop.f32.mrb[17].mxu0  ;;  %v719_v63 = vsel %vm711_vm4, %v1106_v55, -1e+30 }
 0x256   : > { %v717_v59 = vsel %vm709_vm2, %v667_v57, -1e+30  ;;  %v1107_v60 = vpop.f32.mrb[18].mxu0  ;;  %v732_v2 = vsel %vm725_vm3, %v719_v63, -inf }
 0x257   : > { %v670_v61 = vpop.f32.mrb[19].mxu0  ;;  %v726_v62 = vsel %vm725_vm3, %v717_v59, -inf  ;;  %v720_v3 = vsel %vm712_vm6, %v1107_v60, -1e+30 }
 0x258   : > { %v718_v0 = vsel %vm710_vm5, %v670_v61, -1e+30  ;;  %727 = vmax.xlane.f32.xlu0 %v726_v62  ;;  %v735_v4 = vsel %vm725_vm3, %v720_v3, -inf }
 0x259   : > { %v729_v1 = vsel %vm725_vm3, %v718_v0, -inf }
 0x25a   : > { %730 = vmax.xlane.f32.xlu1 %v729_v1 }
 0x25c   : > { %733 = vmax.xlane.f32.xlu0 %v732_v2 }
 0x260   : > { %736 = vmax.xlane.f32.xlu0 %v735_v4 }
 0x264   : > { %v1110_v10 = vpop.f32.mrb[20].mxu0 }
 0x265   : > { %v683_v11 = vpop.f32.mrb[21].mxu0  ;;  %v723_v16 = vsel %vm715_vm8, %v1110_v10, -1e+30 }
 0x266   : > { %v721_v12 = vsel %vm713_vm7, %v683_v11, -1e+30  ;;  %v1111_v13 = vpop.f32.mrb[22].mxu0  ;;  %v744_v20 = vsel %vm725_vm3, %v723_v16, -inf }
 0x267   : > { %v686_v14 = vpop.f32.mrb[23].mxu0  ;;  %v738_v15 = vsel %vm725_vm3, %v721_v12, -inf  ;;  %v724_v19 = vsel %vm716_vm10, %v1111_v13, -1e+30 }
 0x268   : > { %v722_v17 = vsel %vm714_vm9, %v686_v14, -1e+30  ;;  %739 = vmax.xlane.f32.xlu1 %v738_v15  ;;  %v747_v21 = vsel %vm725_vm3, %v724_v19, -inf }
 0x269   : > { %v741_v18 = vsel %vm725_vm3, %v722_v17, -inf }
 0x26a   : > { %742 = vmax.xlane.f32.xlu0 %v741_v18 }
 0x26c   : > { %745 = vmax.xlane.f32.xlu1 %v744_v20 }
 0x26e   : > { %748 = vmax.xlane.f32.xlu0 %v747_v21 }
 0x27d   : > { %822 = vrot.lane.b32.xlu1 %v1374_v56, %s1234_s14 }
 0x2e5   : > { %v728_v22 = vpop.xlane.xlu0 %727 }
 0x2e6   : > { %v750_v23 = vsub.f32 %v717_v59, %v728_v22 }
 0x2e7   : > { %v731_v25 = vpop.xlane.xlu1 %730 }
 0x2e8   : > { %v758_v28 = vmul.f32 1.442695, %v750_v23  ;;  %v751_v30 = vsub.f32 %v718_v0, %v731_v25 }
 0x2e9   : > { %v734_v24 = vpop.xlane.xlu0 %733 }
 0x2ea   : > { %v752_v27 = vsub.f32 %v719_v63, %v734_v24  ;;  %v760_v34 = vmul.f32 1.442695, %v751_v30 }
 0x2ec   : > { %v762_v29 = vmul.f32 1.442695, %v752_v27 }
 0x2ed   : > { %v737_v31 = vpop.xlane.xlu0 %736 }
 0x2ee   : > { %1192 = vpow2.f32 %v762_v29  ;;  %v753_v32 = vsub.f32 %v720_v3, %v737_v31 }
 0x2ef   : > { %1194 = vpow2.f32 %v758_v28 }
 0x2f0   : > { %v764_v33 = vmul.f32 1.442695, %v753_v32 }
 0x2f2   : > { %1196 = vpow2.f32 %v764_v33 }
 0x2f3   : > { %1198 = vpow2.f32 %v760_v34 }
 0x2f5   : > { %v740_v35 = vpop.xlane.xlu1 %739 }
 0x2f6   : > { %v754_v36 = vsub.f32 %v721_v12, %v740_v35 }
 0x2f7   : > { %v743_v37 = vpop.xlane.xlu0 %742 }
 0x2f8   : > { %v1416_v56 = vpop.eup %1192  ;;  %v755_v41 = vsub.f32 %v722_v17, %v743_v37  ;;  %v766_v44 = vmul.f32 1.442695, %v754_v36 }
 0x2f9   : > { %v746_v38 = vpop.xlane.xlu1 %745  ;;  %v780_v39 = vsel %vm725_vm3, %v1416_v56, 0.0  ;;  %v1195_v40 = vpop.eup %1194 }
 0x2fa   : > { %v756_v42 = vsub.f32 %v723_v16, %v746_v38  ;;  %781 = vadd.xlane.f32.xlu1 %v780_v39  ;;  %v774_v50 = vsel %vm725_vm3, %v1195_v40, 0.0  ;;  %v768_v52 = vmul.f32 1.442695, %v755_v41 }
 0x2fb   : > { %v749_v45 = vpop.xlane.xlu0 %748 }
 0x2fc   : > { %v1420_v46 = vpop.eup %1196  ;;  %v770_v47 = vmul.f32 1.442695, %v756_v42  ;;  %v757_v48 = vsub.f32 %v724_v19, %v749_v45 }
 0x2fd   : > { %v823_v49 = vpop.permute.xlu1 %822  ;;  %v783_v51 = vsel %vm725_vm3, %v1420_v46, 0.0  ;;  %v1199_v54 = vpop.eup %1198 }
 0x2fe   : > { %1200 = vpow2.f32 %v770_v47  ;;  %v772_v53 = vmul.f32 1.442695, %v757_v48  ;;  %775 = vadd.xlane.f32.xlu1 %v774_v50  ;;  %1112 = vmatprep.subr.bf16.mxu1 %v823_v49  ;;  %v777_v55 = vsel %vm725_vm3, %v1199_v54, 0.0 }
 0x2ff   : > { %1202 = vpow2.f32 %v766_v44  ;;  %784 = vadd.xlane.f32.xlu0 %v783_v51  ;;  %1113 = vmatpush3.bf16.msra.mxu1 %v823_v49 }
 0x300   : > { %1204 = vpow2.f32 %v772_v53 }
 0x301   : > { %1206 = vpow2.f32 %v768_v52 }
 0x303   : > { %778 = vadd.xlane.f32.xlu0 %v777_v55 }
 0x308   : > { %v1201_v57 = vpop.eup %1200 }
 0x309   : > { %v1203_v58 = vpop.eup %1202  ;;  %v792_v59 = vsel %vm725_vm3, %v1201_v57, 0.0 }
 0x30a   : > { %v1205_v60 = vpop.eup %1204  ;;  %793 = vadd.xlane.f32.xlu1 %v792_v59  ;;  %v786_v63 = vsel %vm725_vm3, %v1203_v58, 0.0 }
 0x30b   : > { %v795_v61 = vsel %vm725_vm3, %v1205_v60, 0.0  ;;  %v1207_v62 = vpop.eup %1206 }
 0x30c   : > { %796 = vadd.xlane.f32.xlu0 %v795_v61  ;;  %v789_v0 = vsel %vm725_vm3, %v1207_v62, 0.0 }
 0x30e   : > { %787 = vadd.xlane.f32.xlu1 %v786_v63 }
 0x310   : > { %790 = vadd.xlane.f32.xlu0 %v789_v0 }
 0x31f   : > { %826 = vrot.lane.b32.xlu1 %v1388_v26, %s1234_s14 }
 0x323   : > { %828 = vrot.lane.b32.xlu1 %v1395_v43, %s1234_s14 }
 0x326   : > { %824 = vrot.lane.b32.xlu0 %v1381_v9, %s1234_s14 }
 0x387   : > { %v782_v1 = vpop.xlane.xlu1 %781 }
 0x38b   : > { %v776_v2 = vpop.xlane.xlu1 %775 }
 0x38c   : > { %v785_v3 = vpop.xlane.xlu0 %784  ;;  %1208 = vrcp.f32 %v776_v2 }
 0x390   : > { %v779_v4 = vpop.xlane.xlu0 %778 }
 0x391   : > { %1210 = vrcp.f32 %v779_v4 }
 0x392   : > { %1212 = vrcp.f32 %v785_v3 }
 0x393   : > { %1214 = vrcp.f32 %v782_v1 }
 0x396   : > { %v1209_v6 = vpop.eup %1208 }
 0x397   : > { %v794_v5 = vpop.xlane.xlu1 %793  ;;  %v806_v26 = vmul.f32 %v1209_v6, %v1195_v40 }
 0x399   : > { %v797_v7 = vpop.xlane.xlu0 %796 }
 0x39b   : > { %v1211_v8 = vpop.eup %1210  ;;  %v788_v10 = vpop.xlane.xlu1 %787 }
 0x39c   : > { %v807_v11 = vmul.f32 %v1211_v8, %v1199_v54  ;;  %1216 = vrcp.f32 %v788_v10  ;;  %v1213_v14 = vpop.eup %1212 }
 0x39d   : > { %v791_v43 = vpop.xlane.xlu0 %790  ;;  %v1215_v15 = vpop.eup %1214  ;;  %v809_v19 = vmul.f32 %v1213_v14, %v1420_v46 }
 0x39e   : > { %1218 = vrcp.f32 %v791_v43  ;;  %v814_v12 = vpack.c.bf16 %v807_v11, %v806_v26  ;;  %v808_v21 = vmul.f32 %v1215_v15, %v1416_v56 }
 0x39f   : > { %v827_v9 = vpop.permute.xlu1 %826  ;;  %1220 = vrcp.f32 %v797_v7 }
 0x3a0   : > { %1120 = vmatprep.mubr.msk.bf16.mxu1 %vm725_vm3, %v814_v12  ;;  %1222 = vrcp.f32 %v794_v5  ;;  %v815_v23 = vpack.c.bf16 %v809_v19, %v808_v21 }
 0x3a1   : > { %v825_v13 = vpop.permute.xlu0 %824 }
 0x3a2   : > { %1114 = vmatprep.subr.bf16.mxu1 %v825_v13 }
 0x3a3   : > { %1115 = vmatpush3.bf16.msra.mxu1 %v825_v13  ;;  %v829_v17 = vpop.permute.xlu1 %828 }
 0x3a4   : > { %1116 = vmatprep.subr.bf16.mxu1 %v827_v9 }
 0x3a6   : > { %v1217_v16 = vpop.eup %1216 }
 0x3a7   : > { %1117 = vmatpush3.bf16.msra.mxu1 %v827_v9  ;;  %v810_v22 = vmul.f32 %v1217_v16, %v1203_v58 }
 0x3a8   : > { %v1219_v18 = vpop.eup %1218  ;;  %1118 = vmatprep.subr.bf16.mxu1 %v829_v17 }
 0x3a9   : > { %v811_v20 = vmul.f32 %v1219_v18, %v1207_v62  ;;  %v1221_v24 = vpop.eup %1220 }
 0x3aa   : > { %v1223_v27 = vpop.eup %1222  ;;  %v813_v28 = vmul.f32 %v1221_v24, %v1205_v60 }
 0x3ab   : > { %1119 = vmatpush3.bf16.msra.mxu1 %v829_v17  ;;  %v816_v25 = vpack.c.bf16 %v811_v20, %v810_v22  ;;  %v812_v29 = vmul.f32 %v1223_v27, %v1201_v57 }
 0x3ad   : > { %v817_v30 = vpack.c.bf16 %v813_v28, %v812_v29 }
 0x3ae   : > { %1121 = vmatmul.mubr.msk.bf16.vlgmr.msra.gmra.mrb[16].mxu1 %vm725_vm3, %v815_v23 }
 0x3af   : > { %1124 = vmatprep.mubr.msk.bf16.mxu1 %vm725_vm3, %v816_v25 }
 0x3b6   : > { %1125 = vmatmul.mubr.msk.bf16.gmra.mrb[20].mxu1 %vm725_vm3, %v817_v30 }
 0x481   : > { %v1122_v31 = vpop.f32.mrb[16].mxu1 }
 0x482   : > { %913 = vst.msk [vmem:[%s143_s18 + $0x10] sm:$0xff] %vm608_vm1, %v1122_v31  ;;  %v880_v32 = vpop.f32.mrb[17].mxu1 }
 0x483   : > { %911 = vst.msk [vmem:[%s143_s18] sm:$0xff] %vm608_vm1, %v880_v32  ;;  %v1123_v33 = vpop.f32.mrb[18].mxu1 }
 0x484   : > { %914 = vst.msk [vmem:[%s143_s18 + $0x18] sm:$0xff] %vm608_vm1, %v1123_v33  ;;  %v883_v34 = vpop.f32.mrb[19].mxu1 }
 0x485   : > { %912 = vst.msk [vmem:[%s143_s18 + $0x8] sm:$0xff] %vm608_vm1, %v883_v34 }
 0x489   : > { %v1126_v35 = vpop.f32.mrb[20].mxu1 }
 0x48a   : > { %917 = vst.msk [vmem:[%s143_s18 + $0x30] sm:$0xff] %vm608_vm1, %v1126_v35  ;;  %v896_v36 = vpop.f32.mrb[21].mxu1 }
 0x48b   : > { %915 = vst.msk [vmem:[%s143_s18 + $0x20] sm:$0xff] %vm608_vm1, %v896_v36  ;;  %v1127_v37 = vpop.f32.mrb[22].mxu1 }
 0x48c   : > { %918 = vst.msk [vmem:[%s143_s18 + $0x38] sm:$0xff] %vm608_vm1, %v1127_v37  ;;  %v899_v56 = vpop.f32.mrb[23].mxu1 }
 0x48d   : > { %916 = vst.msk [vmem:[%s143_s18 + $0x28] sm:$0xff] %vm608_vm1, %v899_v56 }
 0x48e PF: > { %s12_s9 = sadd.s32 1, %s1230_s9  }
 0x48f   : > { %p9_p4 = scmp.ge.s32.totalorder %s12_s9, 4  }
 0x491   :  { %11 = sbr.rel (!%p9_p4) target bundleno = 1 (0x1), region = 58 }

</bundles_post_ra>
